<compile_context>
chip_gen: v5e
topology: v5e:2x2
jax: 0.10.0
libtpu: 0.0.40
codegen_flags: <defaults>
</compile_context>

<pallas_src>
import functools

import jax
import jax.numpy as jnp
from jax.experimental import pallas as pl
from jax.experimental.pallas import tpu as pltpu


HID1, HID2 = 400, 300          # true hidden dims (PyTorch spec)
HID1_PAD, HID2_PAD = 512, 384  # lane-multiple padded hidden dims
ACT_PAD = 128                  # lane-dense output slab width
MAX_TB = 1024                  # batch-tile cap (v5e scoped-VMEM safety)


def _round_up(v, m):
    return ((v + m - 1) // m) * m


def _choose_batch_tile(B):
    """Adaptive batch tile: big enough to amortize per-step overhead, small
    enough to fit scoped VMEM, and (for B > 8) >= 2 tiles for v7x megacore."""
    if B <= 8:
        return 8
    return max(8, min(MAX_TB, _round_up(pl.cdiv(B, 2), 8)))


# ----------------------------------------------------------------------------
# Kernels
# ----------------------------------------------------------------------------
def actor_kernel(x_ref, w1_ref, b1_ref, w2_ref, b2_ref, w3_ref, b3_ref,
                 o_ref, *, max_action):
    """Multi-tile path: all weights VMEM-resident via constant index_maps."""
    # Layer 1: Linear(state_dim -> 512pad) + ReLU   (bf16 operands, f32 acc)
    x = x_ref[...].astype(jnp.bfloat16)
    h1 = jnp.dot(x, w1_ref[...], preferred_element_type=jnp.float32)
    h1 = jnp.maximum(h1 + b1_ref[...], 0.0)
    # Layer 2: Linear(512pad -> 384pad) + ReLU
    h2 = jnp.dot(h1.astype(jnp.bfloat16), w2_ref[...],
                 preferred_element_type=jnp.float32)
    h2 = jnp.maximum(h2 + b2_ref[...], 0.0)
    # Layer 3: Linear(384pad -> 128pad), tanh, scale
    h3 = jnp.dot(h2.astype(jnp.bfloat16), w3_ref[...],
                 preferred_element_type=jnp.float32)
    o_ref[...] = (max_action * jnp.tanh(h3 + b3_ref[...])).astype(o_ref.dtype)


def actor_kernel_overlap(x_ref, w1_ref, b1_ref, w2_hbm, b2_ref, w3_hbm, b3_ref,
                         o_ref, w2_buf, w3_buf, dma_sem, *, max_action):
    """Single-tile path: overlap w2/w3 HBM->VMEM DMA with layer-1/2 compute."""
    cp2 = pltpu.make_async_copy(w2_hbm, w2_buf, dma_sem.at[0])
    cp3 = pltpu.make_async_copy(w3_hbm, w3_buf, dma_sem.at[1])
    cp2.start()
    cp3.start()

    # Layer 1 only needs w1 (already resident) -> runs while w2/w3 stream in.
    x = x_ref[...].astype(jnp.bfloat16)
    h1 = jnp.dot(x, w1_ref[...], preferred_element_type=jnp.float32)
    h1 = jnp.maximum(h1 + b1_ref[...], 0.0)

    cp2.wait()
    h2 = jnp.dot(h1.astype(jnp.bfloat16), w2_buf[...],
                 preferred_element_type=jnp.float32)
    h2 = jnp.maximum(h2 + b2_ref[...], 0.0)

    cp3.wait()
    h3 = jnp.dot(h2.astype(jnp.bfloat16), w3_buf[...],
                 preferred_element_type=jnp.float32)
    o_ref[...] = (max_action * jnp.tanh(h3 + b3_ref[...])).astype(o_ref.dtype)


# ----------------------------------------------------------------------------
# Wrapper
# ----------------------------------------------------------------------------
def actor_forward(x, params, action_dim, max_action=1.0, *, batch_tile=None,
                  out_dtype=jnp.float32):
    """x: [B, state_dim] f32.  params: padded bf16 weights / f32 biases.
    out_dtype=jnp.bfloat16 halves the output HBM writeback (tanh outputs are
    well-conditioned in bf16); default f32 matches the PyTorch module."""
    w1, b1 = params["w1"], params["b1"]
    w2, b2 = params["w2"], params["b2"]
    w3, b3 = params["w3"], params["b3"]
    B, state_dim = x.shape

    TB = batch_tile if batch_tile is not None else _choose_batch_tile(B)
    n_tiles = pl.cdiv(B, TB)
    B_pad = n_tiles * TB
    if B_pad != B:
        # Zero-pad the batch so every grid step sees a full, well-defined tile.
        x = jnp.pad(x, ((0, B_pad - B), (0, 0)))

    x_spec = pl.BlockSpec((TB, state_dim), lambda i: (i, 0))
    out_spec = pl.BlockSpec((TB, ACT_PAD), lambda i: (i, 0))
    resident = lambda a: pl.BlockSpec(a.shape, lambda i: (0, 0))
    out_shape = jax.ShapeDtypeStruct((B_pad, ACT_PAD), out_dtype)
    ma = float(max_action)

    if n_tiles == 1:
        # Inference / small-batch path: no pipelining possible with one grid
        # step, so hide the w2/w3 HBM fetch behind the layer-1/2 matmuls.
        out = pl.pallas_call(
            functools.partial(actor_kernel_overlap, max_action=ma),
            out_shape=out_shape,
            grid=(1,),
            in_specs=[x_spec,
                      resident(w1), resident(b1),
                      pl.BlockSpec(memory_space=pl.ANY), resident(b2),
                      pl.BlockSpec(memory_space=pl.ANY), resident(b3)],
            out_specs=out_spec,
            scratch_shapes=[pltpu.VMEM(w2.shape, w2.dtype),
                            pltpu.VMEM(w3.shape, w3.dtype),
                            pltpu.SemaphoreType.DMA((2,))],
            compiler_params=pltpu.CompilerParams(
                dimension_semantics=("arbitrary",),
                vmem_limit_bytes=32 * 1024 * 1024),
        )(x, w1, b1, w2, b2, w3, b3)
    else:
        # Batched path: weights/biases stay VMEM-resident (constant index_map),
        # x/out stream per batch tile; batch axis sharded across cores on v7x.
        out = pl.pallas_call(
            functools.partial(actor_kernel, max_action=ma),
            out_shape=out_shape,
            grid=(n_tiles,),
            in_specs=[x_spec, resident(w1), resident(b1), resident(w2),
                      resident(b2), resident(w3), resident(b3)],
            out_specs=out_spec,
            compiler_params=pltpu.CompilerParams(
                dimension_semantics=("parallel",),
                vmem_limit_bytes=32 * 1024 * 1024),
        )(x, w1, b1, w2, b2, w3, b3)

    # Drop batch padding and the lane-padded output columns.
    return out[:B, :action_dim]


# ----------------------------------------------------------------------------
# Params / references
# ----------------------------------------------------------------------------
def init_actor_params(key, state_dim, action_dim):
    """PyTorch nn.Linear-style init U(-1/sqrt(fan_in), 1/sqrt(fan_in)),
    zero-padded to lane-multiple shapes; weights stored bf16 as
    [in_features, out_features], biases f32 as [1, out_features]."""
    def linear(key, fan_in, fan_out, pad_in, pad_out):
        kw, kb = jax.random.split(key)
        bound = 1.0 / jnp.sqrt(float(fan_in))
        w = jax.random.uniform(kw, (fan_in, fan_out), jnp.float32,
                               minval=-bound, maxval=bound)
        b = jax.random.uniform(kb, (1, fan_out), jnp.float32,
                               minval=-bound, maxval=bound)
        w = jnp.pad(w, ((0, pad_in - fan_in), (0, pad_out - fan_out)))
        b = jnp.pad(b, ((0, 0), (0, pad_out - fan_out)))
        return w.astype(jnp.bfloat16), b

    k1, k2, k3 = jax.random.split(key, 3)
    w1, b1 = linear(k1, state_dim, HID1, state_dim, HID1_PAD)
    w2, b2 = linear(k2, HID1, HID2, HID1_PAD, HID2_PAD)
    w3, b3 = linear(k3, HID2, action_dim, HID2_PAD, ACT_PAD)
    return {"w1": w1, "b1": b1, "w2": w2, "b2": b2, "w3": w3, "b3": b3}


def actor_ref(x, params, action_dim, max_action=1.0):
    """Pure-JAX reference mirroring the kernel's mixed precision exactly."""
    h1 = jnp.dot(x.astype(jnp.bfloat16), params["w1"],
                 preferred_element_type=jnp.float32) + params["b1"]
    h1 = jnp.maximum(h1, 0.0)
    h2 = jnp.dot(h1.astype(jnp.bfloat16), params["w2"],
                 preferred_element_type=jnp.float32) + params["b2"]
    h2 = jnp.maximum(h2, 0.0)
    h3 = jnp.dot(h2.astype(jnp.bfloat16), params["w3"],
                 preferred_element_type=jnp.float32) + params["b3"]
    return (max_action * jnp.tanh(h3))[:, :action_dim]


def actor_ref_f32(x, params, action_dim, max_action=1.0):
    """Full-f32 reference (PyTorch-module semantics) for a loose check.
    NOTE: the kernel uses bf16 weights/activations with f32 accumulation, so
    per-element deviation vs pure f32 is at the ~1e-2 level by design."""
    w1, w2, w3 = (params[k].astype(jnp.float32) for k in ("w1", "w2", "w3"))
    h = jnp.maximum(x @ w1 + params["b1"], 0.0)
    h = jnp.maximum(h @ w2 + params["b2"], 0.0)
    return (max_action * jnp.tanh(h @ w3 + params["b3"]))[:, :action_dim]


if __name__ == "__main__":
    key = jax.random.PRNGKey(0)
    k_param, k_x1, k_x2 = jax.random.split(key, 3)

    state_dim, action_dim, max_action = 16, 4, 1.0
    params = init_actor_params(k_param, state_dim, action_dim)

    # 1) Small batch -> single-tile inference path (manual w2/w3 DMA overlap).
    x_small = jax.random.normal(k_x1, (2, state_dim), jnp.float32)
    out_small = jax.block_until_ready(
        actor_forward(x_small, params, action_dim, max_action))
    assert out_small.shape == (2, action_dim)
    ref_small = actor_ref(x_small, params, action_dim, max_action)
    assert jnp.allclose(out_small, ref_small, atol=1e-3, rtol=1e-3), \
        "single-tile: mismatch vs mixed-precision reference"
    ref32_small = actor_ref_f32(x_small, params, action_dim, max_action)
    assert jnp.allclose(out_small, ref32_small, atol=3e-2, rtol=3e-2), \
        "single-tile: mismatch vs f32 reference"

    # 2) Larger batch -> multi-tile (>=2 tiles) resident-weight path.
    x_big = jax.random.normal(k_x2, (40, state_dim), jnp.float32)
    out_big = jax.block_until_ready(
        actor_forward(x_big, params, action_dim, max_action))
    assert out_big.shape == (40, action_dim)
    ref_big = actor_ref(x_big, params, action_dim, max_action)
    assert jnp.allclose(out_big, ref_big, atol=1e-3, rtol=1e-3), \
        "multi-tile: mismatch vs mixed-precision reference"

    # 3) Optional bf16 output slab (halves HBM writeback); looser tolerance.
    out_bf16 = jax.block_until_ready(
        actor_forward(x_big, params, action_dim, max_action,
                      out_dtype=jnp.bfloat16))
    assert jnp.allclose(out_bf16.astype(jnp.float32), ref_big,
                        atol=1e-2, rtol=1e-2), \
        "bf16-output: mismatch vs mixed-precision reference"

    print("KERNEL_OK")
</pallas_src>

<mosaic_0001>
module attributes {stable_mosaic.version = 11 : i64} {
  func.func @actor_kernel_overlap(%arg0: i32, %arg1: memref<8x16xf32, #tpu.memory_space<vmem>>, %arg2: memref<16x512xbf16, #tpu.memory_space<vmem>>, %arg3: memref<1x512xf32, #tpu.memory_space<vmem>>, %arg4: memref<512x384xbf16, #tpu.memory_space<any>>, %arg5: memref<1x384xf32, #tpu.memory_space<vmem>>, %arg6: memref<384x128xbf16, #tpu.memory_space<any>>, %arg7: memref<1x128xf32, #tpu.memory_space<vmem>>, %arg8: memref<8x128xf32, #tpu.memory_space<vmem>>, %arg9: memref<512x384xbf16, #tpu.memory_space<vmem>>, %arg10: memref<384x128xbf16, #tpu.memory_space<vmem>>, %arg11: memref<2x!tpu.dma_semaphore, #tpu.memory_space<semaphore_mem>>) attributes {dimension_semantics = [#tpu.dimension_semantics<arbitrary>], iteration_bounds = array<i64: 1>, scalar_prefetch = 0 : i64, scratch_operands = 3 : i64, tpu.core_type = #tpu.core_type<tc>, window_params = [{transform_indices = @transform_0, window_bounds = array<i64: 8, 16>}, {pipeline_mode = #tpu.pipeline_mode<synchronous>, transform_indices = @transform_1, window_bounds = array<i64: 16, 512>}, {pipeline_mode = #tpu.pipeline_mode<synchronous>, transform_indices = @transform_2, window_bounds = array<i64: 1, 512>}, {}, {pipeline_mode = #tpu.pipeline_mode<synchronous>, transform_indices = @transform_4, window_bounds = array<i64: 1, 384>}, {}, {pipeline_mode = #tpu.pipeline_mode<synchronous>, transform_indices = @transform_6, window_bounds = array<i64: 1, 128>}, {transform_indices = @transform_7, window_bounds = array<i64: 8, 128>}]} {
    %c0_i32 = arith.constant 0 : i32
    %0 = tpu.memref_slice %arg11[%c0_i32] : memref<2x!tpu.dma_semaphore, #tpu.memory_space<semaphore_mem>> -> memref<1x!tpu.dma_semaphore, #tpu.memory_space<semaphore_mem>>
    %1 = tpu.memref_squeeze %0 : memref<1x!tpu.dma_semaphore, #tpu.memory_space<semaphore_mem>> -> memref<!tpu.dma_semaphore, #tpu.memory_space<semaphore_mem>>
    tpu.enqueue_dma source(%arg4 : memref<512x384xbf16, #tpu.memory_space<any>>) target(%arg9 : memref<512x384xbf16, #tpu.memory_space<vmem>>) target_semaphore(%1 : memref<!tpu.dma_semaphore, #tpu.memory_space<semaphore_mem>>)
    %c1_i32 = arith.constant 1 : i32
    %2 = tpu.memref_slice %arg11[%c1_i32] : memref<2x!tpu.dma_semaphore, #tpu.memory_space<semaphore_mem>> -> memref<1x!tpu.dma_semaphore, #tpu.memory_space<semaphore_mem>>
    %3 = tpu.memref_squeeze %2 : memref<1x!tpu.dma_semaphore, #tpu.memory_space<semaphore_mem>> -> memref<!tpu.dma_semaphore, #tpu.memory_space<semaphore_mem>>
    tpu.enqueue_dma source(%arg6 : memref<384x128xbf16, #tpu.memory_space<any>>) target(%arg10 : memref<384x128xbf16, #tpu.memory_space<vmem>>) target_semaphore(%3 : memref<!tpu.dma_semaphore, #tpu.memory_space<semaphore_mem>>)
    %c0 = arith.constant 0 : index
    %c0_0 = arith.constant 0 : index
    %4 = vector.load %arg1[%c0, %c0_0] : memref<8x16xf32, #tpu.memory_space<vmem>>, vector<8x16xf32>
    %5 = arith.truncf %4 : vector<8x16xf32> to vector<8x16xbf16>
    %c0_1 = arith.constant 0 : index
    %c0_2 = arith.constant 0 : index
    %6 = vector.load %arg2[%c0_1, %c0_2] : memref<16x512xbf16, #tpu.memory_space<vmem>>, vector<16x512xbf16>
    %cst = arith.constant dense<0.000000e+00> : vector<8x512xf32>
    %7 = tpu.matmul %5, %6, %cst {dimension_numbers = #tpu.dot_dimension_numbers<[1], [0], [0], [1], [0, 0, 1, 1], [], []>} : vector<8x16xbf16>, vector<16x512xbf16>, vector<8x512xf32> -> vector<8x512xf32>
    %c0_3 = arith.constant 0 : index
    %c0_4 = arith.constant 0 : index
    %8 = vector.load %arg3[%c0_3, %c0_4] : memref<1x512xf32, #tpu.memory_space<vmem>>, vector<1x512xf32>
    %9 = vector.broadcast %8 : vector<1x512xf32> to vector<8x512xf32>
    %10 = arith.addf %7, %9 : vector<8x512xf32>
    %cst_5 = arith.constant 0.000000e+00 : f32
    %11 = vector.broadcast %cst_5 : f32 to vector<8x512xf32>
    %12 = arith.maximumf %10, %11 : vector<8x512xf32>
    %c0_i32_6 = arith.constant 0 : i32
    %13 = tpu.memref_slice %arg11[%c0_i32_6] : memref<2x!tpu.dma_semaphore, #tpu.memory_space<semaphore_mem>> -> memref<1x!tpu.dma_semaphore, #tpu.memory_space<semaphore_mem>>
    %14 = tpu.memref_squeeze %13 : memref<1x!tpu.dma_semaphore, #tpu.memory_space<semaphore_mem>> -> memref<!tpu.dma_semaphore, #tpu.memory_space<semaphore_mem>>
    tpu.wait_dma2 semaphore(%14 : memref<!tpu.dma_semaphore, #tpu.memory_space<semaphore_mem>>) src(%arg4 : memref<512x384xbf16, #tpu.memory_space<any>>) dst(%arg9 : memref<512x384xbf16, #tpu.memory_space<vmem>>)
    %15 = arith.truncf %12 : vector<8x512xf32> to vector<8x512xbf16>
    %c0_7 = arith.constant 0 : index
    %c0_8 = arith.constant 0 : index
    %16 = vector.load %arg9[%c0_7, %c0_8] : memref<512x384xbf16, #tpu.memory_space<vmem>>, vector<512x384xbf16>
    %cst_9 = arith.constant dense<0.000000e+00> : vector<8x384xf32>
    %17 = tpu.matmul %15, %16, %cst_9 {dimension_numbers = #tpu.dot_dimension_numbers<[1], [0], [0], [1], [0, 0, 1, 1], [], []>} : vector<8x512xbf16>, vector<512x384xbf16>, vector<8x384xf32> -> vector<8x384xf32>
    %c0_10 = arith.constant 0 : index
    %c0_11 = arith.constant 0 : index
    %18 = vector.load %arg5[%c0_10, %c0_11] : memref<1x384xf32, #tpu.memory_space<vmem>>, vector<1x384xf32>
    %19 = vector.broadcast %18 : vector<1x384xf32> to vector<8x384xf32>
    %20 = arith.addf %17, %19 : vector<8x384xf32>
    %cst_12 = arith.constant 0.000000e+00 : f32
    %21 = vector.broadcast %cst_12 : f32 to vector<8x384xf32>
    %22 = arith.maximumf %20, %21 : vector<8x384xf32>
    %c1_i32_13 = arith.constant 1 : i32
    %23 = tpu.memref_slice %arg11[%c1_i32_13] : memref<2x!tpu.dma_semaphore, #tpu.memory_space<semaphore_mem>> -> memref<1x!tpu.dma_semaphore, #tpu.memory_space<semaphore_mem>>
    %24 = tpu.memref_squeeze %23 : memref<1x!tpu.dma_semaphore, #tpu.memory_space<semaphore_mem>> -> memref<!tpu.dma_semaphore, #tpu.memory_space<semaphore_mem>>
    tpu.wait_dma2 semaphore(%24 : memref<!tpu.dma_semaphore, #tpu.memory_space<semaphore_mem>>) src(%arg6 : memref<384x128xbf16, #tpu.memory_space<any>>) dst(%arg10 : memref<384x128xbf16, #tpu.memory_space<vmem>>)
    %25 = arith.truncf %22 : vector<8x384xf32> to vector<8x384xbf16>
    %c0_14 = arith.constant 0 : index
    %c0_15 = arith.constant 0 : index
    %26 = vector.load %arg10[%c0_14, %c0_15] : memref<384x128xbf16, #tpu.memory_space<vmem>>, vector<384x128xbf16>
    %cst_16 = arith.constant dense<0.000000e+00> : vector<8x128xf32>
    %27 = tpu.matmul %25, %26, %cst_16 {dimension_numbers = #tpu.dot_dimension_numbers<[1], [0], [0], [1], [0, 0, 1, 1], [], []>} : vector<8x384xbf16>, vector<384x128xbf16>, vector<8x128xf32> -> vector<8x128xf32>
    %c0_17 = arith.constant 0 : index
    %c0_18 = arith.constant 0 : index
    %28 = vector.load %arg7[%c0_17, %c0_18] : memref<1x128xf32, #tpu.memory_space<vmem>>, vector<1x128xf32>
    %29 = vector.broadcast %28 : vector<1x128xf32> to vector<8x128xf32>
    %30 = arith.addf %27, %29 : vector<8x128xf32>
    %31 = math.tanh %30 : vector<8x128xf32>
    %cst_19 = arith.constant 1.000000e+00 : f32
    %32 = vector.broadcast %cst_19 : f32 to vector<8x128xf32>
    %33 = arith.mulf %32, %31 : vector<8x128xf32>
    %c0_20 = arith.constant 0 : index
    %c0_21 = arith.constant 0 : index
    %34 = vector.load %arg8[%c0_20, %c0_21] : memref<8x128xf32, #tpu.memory_space<vmem>>, vector<8x128xf32>
    tpu.vector_store %arg8[%c0_20, %c0_21], %33 {strides = array<i32>} : memref<8x128xf32, #tpu.memory_space<vmem>>, vector<8x128xf32>,
    return
  }
  func.func @transform_0(%arg0: i32) -> (i32, i32) {
    %c0_i32 = arith.constant 0 : i32
    %c0_i32_0 = arith.constant 0 : i32
    return %arg0, %c0_i32 : i32, i32
  }
  func.func @transform_1(%arg0: i32) -> (i32, i32) {
    %c0_i32 = arith.constant 0 : i32
    %c0_i32_0 = arith.constant 0 : i32
    %c0_i32_1 = arith.constant 0 : i32
    return %c0_i32, %c0_i32_0 : i32, i32
  }
  func.func @transform_2(%arg0: i32) -> (i32, i32) {
    %c0_i32 = arith.constant 0 : i32
    %c0_i32_0 = arith.constant 0 : i32
    %c0_i32_1 = arith.constant 0 : i32
    return %c0_i32, %c0_i32_0 : i32, i32
  }
  func.func @transform_4(%arg0: i32) -> (i32, i32) {
    %c0_i32 = arith.constant 0 : i32
    %c0_i32_0 = arith.constant 0 : i32
    %c0_i32_1 = arith.constant 0 : i32
    return %c0_i32, %c0_i32_0 : i32, i32
  }
  func.func @transform_6(%arg0: i32) -> (i32, i32) {
    %c0_i32 = arith.constant 0 : i32
    %c0_i32_0 = arith.constant 0 : i32
    %c0_i32_1 = arith.constant 0 : i32
    return %c0_i32, %c0_i32_0 : i32, i32
  }
  func.func @transform_7(%arg0: i32) -> (i32, i32) {
    %c0_i32 = arith.constant 0 : i32
    %c0_i32_0 = arith.constant 0 : i32
    return %arg0, %c0_i32 : i32, i32
  }
}

</mosaic_0001>

<bundles_post_ra>
// kernel: tpu_custom_call.1
= control target key start
LH: loop header
LB: loop body
LE: loop exit
PB: predicated region body
PF: predicated region fallthrough
CT: control target
= control target key end

     0   :  { %12 = vsyncpa [#allocation6], 0  ;;  %s2199_s0 = inlined_call_operand.hbm [shape: f32[8,16], index: 0, kind: input, shape index: {}]   ;;  %s2200_s1 = inlined_call_operand.hbm [shape: bf16[16,512], index: 1, kind: input, shape index: {}]   ;;  %s2201_s2 = inlined_call_operand.hbm [shape: f32[1,512], index: 2, kind: input, shape index: {}]   ;;  %s2202_s3 = inlined_call_operand.hbm [shape: bf16[512,384], index: 3, kind: input, shape index: {}]   ;;  %s2203_s4 = inlined_call_operand.vmem [shape: f32[1,384], index: 4, kind: input, shape index: {}]   ;;  %s2204_s5 = inlined_call_operand.hbm [shape: bf16[384,128], index: 5, kind: input, shape index: {}]   ;;  %s2205_s6 = inlined_call_operand.vmem [shape: f32[1,128], index: 6, kind: input, shape index: {}]   ;;  %s2206_s7 = inlined_call_operand.hbm [shape: f32[8,128], index: 7, kind: output, shape index: {}]  }
   0x1   :  { %13 = vsyncpa [#allocation9], 0  ;;  %s30_s26 = sshll.u32 %s2200_s1, 4  ;;  %s31_s26 = int_to_ptr.hbm [resolvable:$true] %s30_s26 }
   0x2   :  { %14 = vsyncpa [#allocation7], 0  ;;  %s2071_s27 = smov [#allocation8]   ;;  %s20_s8 = sshll.u32 %s2199_s0, 4  ;;  %s21_s8 = int_to_ptr.hbm [resolvable:$true] %s20_s8 }
   0x3   :  { %s32_s28 = sshll.u32 %s2071_s27, 4  ;;  %s2072_s9 = smov 256   ;;  %s33_s28 = int_to_ptr.vmem [resolvable:$true] %s32_s28 }
   0x4   :  { %s2073_s10 = smov 16   ;;  %s2074_s11 = smov [#allocation5]  }
   0x5   :  { %38 = dma.hbm_to_vmem [thread:$0]  %s31_s26, 512, %s33_s28, [#allocation9], %s2072_s9, %s2072_s9, %s2073_s10  }
   0x6   :  { %s22_s12 = sshll.u32 %s2074_s11, 4  ;;  %s44_s15 = sshll.u32 %s2201_s2, 4  ;;  %s23_s12 = int_to_ptr.vmem [resolvable:$true] %s22_s12  ;;  %s45_s15 = int_to_ptr.hbm [resolvable:$true] %s44_s15 }
   0x7   :  { %25 = dma.hbm_to_vmem [thread:$0]  %s21_s8, 128, %s23_s12, [#allocation6]  }
   0x8   :  { %s2075_s1 = smov [#allocation10]  }
   0x9   :  { %s46_s16 = sshll.u32 %s2075_s1, 4  ;;  %s47_s16 = int_to_ptr.vmem [resolvable:$true] %s46_s16 }
   0xa   :  { %49 = dma.hbm_to_vmem [thread:$0]  %s45_s15, 64, %s47_s16, [#allocation9]  }
   0xb   :  { %2061 = dma.done.wait [#allocation6], 128  }
   0xc   :  { %2062 = vsyncadd [#allocation6], 4294967168 }
   0xd   :  { %2063 = dma.done.wait [#allocation9], 576  }
   0xe   :  { %2064 = vsyncadd [#allocation9], 4294966720  ;;  %v1282_v0 = vld [vmem:[#allocation8] sm:$0xf]  ;;  %v1784_v1 = vld [vmem:[#allocation8 + $0xc] sm:$0xf0] }
   0xf   :  { %v94_v2 = vld [vmem:[#allocation5] sm:$0xff]  ;;  %v1283_v3 = vor.u32 %v1784_v1, %v1282_v0  ;;  %v1783_v4 = vld [vmem:[#allocation8 + $0xc] sm:$0xf]  ;;  %v1290_v6 = vld [vmem:[#allocation8 + $0x8] sm:$0xf]  ;;  %vm130_vm0 = vcmask 130048  }
  0x10   :  { %v1292_v5 = vld [vmem:[#allocation8 + $0x18] sm:$0xf0]  ;;  %v95_v7 = vpack.c.bf16 %v94_v2, %v94_v2  ;;  %v1785_v9 = vld [vmem:[#allocation8 + $0x14] sm:$0xf0]  ;;  %v1782_v10 = vld [vmem:[#allocation8 + $0x4] sm:$0xf] }
  0x11   :  { %v1295_v8 = vor.u32 %v1783_v4, %v1292_v5  ;;  %v1284_v11 = vld [vmem:[#allocation8 + $0x10] sm:$0xf0]  ;;  %141 = vmatpush.bf16.msra.mxu3 %v1283_v3  ;;  %v1291_v12 = vor.u32 %v1785_v9, %v1290_v6  ;;  %s74_s17 = sshll.u32 %s2202_s3, 4  ;;  %s2076_s18 = smov [#allocation2]   ;;  %v100_v14 = vld [vmem:[#allocation10] sm:$0xf]  ;;  %s75_s17 = int_to_ptr.hbm [resolvable:$true] %s74_s17 }
  0x12   :  { %v1287_v13 = vor.u32 %v1782_v10, %v1284_v11  ;;  %s76_s19 = sshll.u32 %s2076_s18, 4  ;;  %s88_s22 = sshll.u32 %s2204_s5, 4  ;;  %v103_v15 = vperm.slane %v100_v14, 1  ;;  %v102_v17 = vperm.slane %v100_v14, 0  ;;  %v104_v20 = vperm.slane %v100_v14, 2  ;;  %s77_s19 = int_to_ptr.vmem [resolvable:$true] %s76_s19  ;;  %s89_s22 = int_to_ptr.hbm [resolvable:$true] %s88_s22 }
  0x13   :  { %167 = vmatpush.bf16.msra.mxu2 %v1291_v12  ;;  %79 = dma.hbm_to_vmem [thread:$0]  %s75_s17, 12288, %s77_s19, [#allocation4]  ;;  %v105_v30 = vperm.slane %v100_v14, 3 }
  0x14   :  { %154 = vmatpush.bf16.msra.mxu1 %v1287_v13  ;;  %1296 = vmatmul.msk.bf16.vlgmr.msra.gmra.mxu3 %vm130_vm0, %v95_v7  ;;  %s2077_s23 = smov [#allocation3]  }
  0x15   :  { %180 = vmatpush.bf16.msrb.mxu3 %v1295_v8  ;;  %s90_s24 = sshll.u32 %s2077_s23, 4  ;;  %s91_s24 = int_to_ptr.vmem [resolvable:$true] %s90_s24 }
  0x16   :  { %1298 = vmatmul.msk.bf16.vlgmr.msra.gmra.mxu2 %vm130_vm0, %v95_v7  ;;  %93 = dma.hbm_to_vmem [thread:$0]  %s89_s22, 3072, %s91_s24, [#allocation4 + $0x1] }
  0x17   :  { %1297 = vmatmul.msk.bf16.vlgmr.msra.gmra.mxu1 %vm130_vm0, %v95_v7 }
  0x24   :  { %1299 = vmatmul.msk.bf16.vlgmr.msrb.gmra.mxu3 %vm130_vm0, %v95_v7 }
  0x94   :  { %v156_v16 = vpop.f32.mrf.mxu1 }
  0x95   :  { %v2134_v18 = vadd.f32 %v156_v16, %v103_v15 }
  0x97   :  { %v187_v19 = vmax.f32 %v2134_v18, 0.0  ;;  %v143_v21 = vpop.f32.mrf.mxu3 }
  0x98   :  { %v2137_v22 = vadd.f32 %v143_v21, %v102_v17 }
  0x99   :  { %v169_v23 = vpop.f32.mrf.mxu2 }
  0x9a   :  { %v186_v24 = vmax.f32 %v2137_v22, 0.0  ;;  %v2140_v25 = vadd.f32 %v169_v23, %v104_v20 }
  0x9c   :  { %v158_v26 = vpop.f32.mrf.mxu1  ;;  %v188_v27 = vmax.f32 %v2140_v25, 0.0 }
  0x9f   :  { %v145_v28 = vpop.f32.mrf.mxu3 }
  0xa1   :  { %v171_v29 = vpop.f32.mrf.mxu2 }
  0xa7   :  { %v182_v31 = vpop.f32.mrf.mxu3 }
  0xa8   :  { %v2143_v32 = vadd.f32 %v182_v31, %v105_v30 }
  0xaa   :  { %v189_v33 = vmax.f32 %v2143_v32, 0.0 }
  0xaf   :  { %v184_v34 = vpop.f32.mrf.mxu3 }
  0xb0   :  { %2065 = dma.done.wait [#allocation4], 12288 }
  0xb1   :  { %2066 = vsyncadd [#allocation4], 4294955008  ;;  %v1386_v35 = vld [vmem:[#allocation2 + $0xa8] sm:$0xf]  ;;  %v1808_v36 = vld [vmem:[#allocation2 + $0xb0] sm:$0xf0] }
  0xb2   :  { %v1482_v37 = vld [vmem:[#allocation2 + $0x168] sm:$0xf]  ;;  %v1387_v38 = vor.u32 %v1808_v36, %v1386_v35  ;;  %v1832_v39 = vld [vmem:[#allocation2 + $0x170] sm:$0xf0]  ;;  %v1374_v46 = vld [vmem:[#allocation2 + $0x90] sm:$0xf] }
  0xb3   :  { %v1578_v40 = vld [vmem:[#allocation2 + $0x228] sm:$0xf]  ;;  %v1856_v41 = vld [vmem:[#allocation2 + $0x230] sm:$0xf0]  ;;  %v1483_v42 = vor.u32 %v1832_v39, %v1482_v37  ;;  %v1805_v48 = vld [vmem:[#allocation2 + $0x98] sm:$0xf0] }
  0xb4   :  { %v1579_v43 = vor.u32 %v1856_v41, %v1578_v40  ;;  %v1674_v44 = vld [vmem:[#allocation2 + $0x2e8] sm:$0xf]  ;;  %v1880_v45 = vld [vmem:[#allocation2 + $0x2f0] sm:$0xf0]  ;;  %846 = vmatpush.bf16.msra.mxu0 %v1387_v38  ;;  %v1470_v49 = vld [vmem:[#allocation2 + $0x150] sm:$0xf]  ;;  %v1375_v51 = vor.u32 %v1805_v48, %v1374_v46 }
  0xb5   :  { %v1675_v47 = vor.u32 %v1880_v45, %v1674_v44  ;;  %v1829_v50 = vld [vmem:[#allocation2 + $0x158] sm:$0xf0]  ;;  %859 = vmatpush.bf16.msrb.mxu1 %v1483_v42  ;;  %v1566_v53 = vld [vmem:[#allocation2 + $0x210] sm:$0xf]  ;;  %v1362_v58 = vld [vmem:[#allocation2 + $0x78] sm:$0xf] }
  0xb6   :  { %872 = vmatpush.bf16.msrb.mxu2 %v1579_v43  ;;  %v1471_v52 = vor.u32 %v1829_v50, %v1470_v49  ;;  %v1853_v54 = vld [vmem:[#allocation2 + $0x218] sm:$0xf0]  ;;  %v1662_v55 = vld [vmem:[#allocation2 + $0x2d0] sm:$0xf]  ;;  %v1802_v59 = vld [vmem:[#allocation2 + $0x80] sm:$0xf0] }
  0xb7   :  { %885 = vmatpush.bf16.msra.mxu3 %v1675_v47  ;;  %v1567_v56 = vor.u32 %v1853_v54, %v1566_v53  ;;  %v1877_v57 = vld [vmem:[#allocation2 + $0x2d8] sm:$0xf0]  ;;  %v1458_v61 = vld [vmem:[#allocation2 + $0x138] sm:$0xf]  ;;  %v1826_v62 = vld [vmem:[#allocation2 + $0x140] sm:$0xf0]  ;;  %v1363_v0 = vor.u32 %v1802_v59, %v1362_v58 }
  0xb8   :  { %v1663_v60 = vor.u32 %v1877_v57, %v1662_v55  ;;  %v1554_v63 = vld [vmem:[#allocation2 + $0x1f8] sm:$0xf]  ;;  %847 = vmatpush.bf16.msra.mxu0 %v1375_v51  ;;  %v1850_v1 = vld [vmem:[#allocation2 + $0x200] sm:$0xf0]  ;;  %v1459_v4 = vor.u32 %v1826_v62, %v1458_v61  ;;  %v1350_v6 = vld [vmem:[#allocation2 + $0x60] sm:$0xf] }
  0xb9   :  { %v1650_v2 = vld [vmem:[#allocation2 + $0x2b8] sm:$0xf]  ;;  %v1874_v3 = vld [vmem:[#allocation2 + $0x2c0] sm:$0xf0]  ;;  %860 = vmatpush.bf16.msrb.mxu1 %v1471_v52  ;;  %v1555_v5 = vor.u32 %v1850_v1, %v1554_v63  ;;  %v1799_v7 = vld [vmem:[#allocation2 + $0x68] sm:$0xf0] }
  0xba   :  { %873 = vmatpush.bf16.msrb.mxu2 %v1567_v56  ;;  %v1446_v8 = vld [vmem:[#allocation2 + $0x120] sm:$0xf]  ;;  %v1651_v9 = vor.u32 %v1874_v3, %v1650_v2  ;;  %v1823_v10 = vld [vmem:[#allocation2 + $0x128] sm:$0xf0]  ;;  %v1351_v15 = vor.u32 %v1799_v7, %v1350_v6  ;;  %v1338_v20 = vld [vmem:[#allocation2 + $0x48] sm:$0xf] }
  0xbb   :  { %886 = vmatpush.bf16.msra.mxu3 %v1663_v60  ;;  %v1542_v11 = vld [vmem:[#allocation2 + $0x1e0] sm:$0xf]  ;;  %v1847_v12 = vld [vmem:[#allocation2 + $0x1e8] sm:$0xf0]  ;;  %v1447_v16 = vor.u32 %v1823_v10, %v1446_v8  ;;  %v1796_v21 = vld [vmem:[#allocation2 + $0x50] sm:$0xf0] }
  0xbc   :  { %v1638_v13 = vld [vmem:[#allocation2 + $0x2a0] sm:$0xf]  ;;  %v1871_v14 = vld [vmem:[#allocation2 + $0x2a8] sm:$0xf0]  ;;  %848 = vmatpush.bf16.msra.mxu0 %v1363_v0  ;;  %v1543_v17 = vor.u32 %v1847_v12, %v1542_v11  ;;  %v1434_v23 = vld [vmem:[#allocation2 + $0x108] sm:$0xf]  ;;  %v1339_v35 = vor.u32 %v1796_v21, %v1338_v20 }
  0xbd   :  { %861 = vmatpush.bf16.msrb.mxu1 %v1459_v4  ;;  %v1639_v26 = vor.u32 %v1871_v14, %v1638_v13  ;;  %v1820_v28 = vld [vmem:[#allocation2 + $0x110] sm:$0xf0]  ;;  %v1530_v29 = vld [vmem:[#allocation2 + $0x1c8] sm:$0xf]  ;;  %v1326_v38 = vld [vmem:[#allocation2 + $0x30] sm:$0xf] }
  0xbe   :  { %874 = vmatpush.bf16.msrb.mxu2 %v1555_v5  ;;  %v1844_v30 = vld [vmem:[#allocation2 + $0x1d0] sm:$0xf0]  ;;  %v1626_v31 = vld [vmem:[#allocation2 + $0x288] sm:$0xf]  ;;  %v1435_v36 = vor.u32 %v1820_v28, %v1434_v23  ;;  %v1793_v39 = vld [vmem:[#allocation2 + $0x38] sm:$0xf0] }
  0xbf   :  { %887 = vmatpush.bf16.msra.mxu3 %v1651_v9  ;;  %v1868_v34 = vld [vmem:[#allocation2 + $0x290] sm:$0xf0]  ;;  %v1531_v37 = vor.u32 %v1844_v30, %v1530_v29  ;;  %v1422_v40 = vld [vmem:[#allocation2 + $0xf0] sm:$0xf]  ;;  %v1817_v42 = vld [vmem:[#allocation2 + $0xf8] sm:$0xf0]  ;;  %v1327_v47 = vor.u32 %v1793_v39, %v1326_v38 }
  0xc0   :  { %849 = vmatpush.bf16.msra.mxu0 %v1351_v15  ;;  %v1627_v41 = vor.u32 %v1868_v34, %v1626_v31  ;;  %v1518_v43 = vld [vmem:[#allocation2 + $0x1b0] sm:$0xf]  ;;  %v1841_v44 = vld [vmem:[#allocation2 + $0x1b8] sm:$0xf0]  ;;  %v1423_v48 = vor.u32 %v1817_v42, %v1422_v40  ;;  %v1314_v50 = vld [vmem:[#allocation2 + $0x18] sm:$0xf]  ;;  %v2154_v40 = vpack.c.bf16 %v189_v33, %v189_v33 }
  0xc1   :  { %862 = vmatpush.bf16.msrb.mxu1 %v1447_v16  ;;  %v1614_v45 = vld [vmem:[#allocation2 + $0x270] sm:$0xf]  ;;  %v1865_v46 = vld [vmem:[#allocation2 + $0x278] sm:$0xf0]  ;;  %v1519_v49 = vor.u32 %v1841_v44, %v1518_v43  ;;  %v1790_v51 = vld [vmem:[#allocation2 + $0x20] sm:$0xf0] }
  0xc2   :  { %875 = vmatpush.bf16.msrb.mxu2 %v1543_v17  ;;  %v1410_v52 = vld [vmem:[#allocation2 + $0xd8] sm:$0xf]  ;;  %v1615_v53 = vor.u32 %v1865_v46, %v1614_v45  ;;  %v1814_v54 = vld [vmem:[#allocation2 + $0xe0] sm:$0xf0]  ;;  %v1315_v59 = vor.u32 %v1790_v51, %v1314_v50  ;;  %v1302_v60 = vld [vmem:[#allocation2] sm:$0xf] }
  0xc3   :  { %888 = vmatpush.bf16.msra.mxu3 %v1639_v26  ;;  %v1506_v55 = vld [vmem:[#allocation2 + $0x198] sm:$0xf]  ;;  %v1838_v56 = vld [vmem:[#allocation2 + $0x1a0] sm:$0xf0]  ;;  %v1787_v61 = vld [vmem:[#allocation2 + $0x8] sm:$0xf0]  ;;  %v1411_v62 = vor.u32 %v1814_v54, %v1410_v52 }
  0xc4   :  { %850 = vmatpush.bf16.msra.mxu0 %v1339_v35  ;;  %v1602_v57 = vld [vmem:[#allocation2 + $0x258] sm:$0xf]  ;;  %v1862_v58 = vld [vmem:[#allocation2 + $0x260] sm:$0xf0]  ;;  %v1507_v63 = vor.u32 %v1838_v56, %v1506_v55  ;;  %v1398_v0 = vld [vmem:[#allocation2 + $0xc0] sm:$0xf]  ;;  %v1303_v10 = vor.u32 %v1787_v61, %v1302_v60 }
  0xc5   :  { %863 = vmatpush.bf16.msrb.mxu1 %v1435_v36  ;;  %v1811_v1 = vld [vmem:[#allocation2 + $0xc8] sm:$0xf0]  ;;  %v1494_v2 = vld [vmem:[#allocation2 + $0x180] sm:$0xf]  ;;  %v1603_v3 = vor.u32 %v1862_v58, %v1602_v57  ;;  %v1388_v8 = vld [vmem:[#allocation2 + $0xb4] sm:$0xf0] }
  0xc6   :  { %876 = vmatpush.bf16.msrb.mxu2 %v1531_v37  ;;  %v1835_v4 = vld [vmem:[#allocation2 + $0x188] sm:$0xf0]  ;;  %v1590_v5 = vld [vmem:[#allocation2 + $0x240] sm:$0xf]  ;;  %v1484_v11 = vld [vmem:[#allocation2 + $0x174] sm:$0xf0]  ;;  %v1399_v14 = vor.u32 %v1811_v1, %v1398_v0  ;;  %v2149_v37 = vpack.c.bf16 %v188_v27, %v188_v27  ;;  %v2164_v27 = vpack.c.bf16 %v187_v19, %v187_v19 }
  0xc7   :  { %889 = vmatpush.bf16.msra.mxu3 %v1627_v41  ;;  %v1859_v6 = vld [vmem:[#allocation2 + $0x248] sm:$0xf0]  ;;  %v1580_v13 = vld [vmem:[#allocation2 + $0x234] sm:$0xf0]  ;;  %v1495_v15 = vor.u32 %v1835_v4, %v1494_v2  ;;  %v1804_v28 = vld [vmem:[#allocation2 + $0x94] sm:$0xf]  ;;  %v2159_v41 = vpack.c.bf16 %v186_v24, %v186_v24 }
  0xc8   :  { %851 = vmatpush.bf16.msra.mxu0 %v1327_v47  ;;  %v1807_v7 = vld [vmem:[#allocation2 + $0xac] sm:$0xf]  ;;  %v1676_v17 = vld [vmem:[#allocation2 + $0x2f4] sm:$0xf0]  ;;  %v1591_v20 = vor.u32 %v1859_v6, %v1590_v5  ;;  %v1376_v29 = vld [vmem:[#allocation2 + $0x9c] sm:$0xf0] }
  0xc9   :  { %864 = vmatpush.bf16.msrb.mxu1 %v1423_v48  ;;  %v1831_v9 = vld [vmem:[#allocation2 + $0x16c] sm:$0xf]  ;;  %v1391_v21 = vor.u32 %v1807_v7, %v1388_v8  ;;  %v1828_v30 = vld [vmem:[#allocation2 + $0x154] sm:$0xf]  ;;  %v1472_v34 = vld [vmem:[#allocation2 + $0x15c] sm:$0xf0]  ;;  %v1379_v25 = vor.u32 %v1804_v28, %v1376_v29 }
  0xca   :  { %877 = vmatpush.bf16.msrb.mxu2 %v1519_v49  ;;  %v1855_v12 = vld [vmem:[#allocation2 + $0x22c] sm:$0xf]  ;;  %v1487_v23 = vor.u32 %v1831_v9, %v1484_v11  ;;  %v1852_v35 = vld [vmem:[#allocation2 + $0x214] sm:$0xf]  ;;  %v1568_v36 = vld [vmem:[#allocation2 + $0x21c] sm:$0xf0]  ;;  %v1475_v42 = vor.u32 %v1828_v30, %v1472_v34 }
  0xcb   :  { %890 = vmatpush.bf16.msra.mxu3 %v1615_v53  ;;  %v1879_v16 = vld [vmem:[#allocation2 + $0x2ec] sm:$0xf]  ;;  %v1583_v26 = vor.u32 %v1855_v12, %v1580_v13  ;;  %v1876_v38 = vld [vmem:[#allocation2 + $0x2d4] sm:$0xf]  ;;  %v1664_v39 = vld [vmem:[#allocation2 + $0x2dc] sm:$0xf0]  ;;  %v1571_v32 = vor.u32 %v1852_v35, %v1568_v36 }
  0xcc   :  { %852 = vmatpush.bf16.msra.mxu0 %v1315_v59  ;;  %v1679_v31 = vor.u32 %v1879_v16, %v1676_v17  ;;  %v1801_v43 = vld [vmem:[#allocation2 + $0x7c] sm:$0xf]  ;;  %v1364_v33 = vld [vmem:[#allocation2 + $0x84] sm:$0xf0]  ;;  %v1667_v22 = vor.u32 %v1876_v38, %v1664_v39  ;;  %v1798_v50 = vld [vmem:[#allocation2 + $0x64] sm:$0xf] }
  0xcd   :  { %865 = vmatpush.bf16.msrb.mxu1 %v1411_v62  ;;  %v1825_v44 = vld [vmem:[#allocation2 + $0x13c] sm:$0xf]  ;;  %v1460_v45 = vld [vmem:[#allocation2 + $0x144] sm:$0xf0]  ;;  %v1367_v18 = vor.u32 %v1801_v43, %v1364_v33  ;;  %v1352_v51 = vld [vmem:[#allocation2 + $0x6c] sm:$0xf0] }
  0xce   :  { %878 = vmatpush.bf16.msrb.mxu2 %v1507_v63  ;;  %v1849_v24 = vld [vmem:[#allocation2 + $0x1fc] sm:$0xf]  ;;  %v1556_v46 = vld [vmem:[#allocation2 + $0x204] sm:$0xf0]  ;;  %v1463_v19 = vor.u32 %v1825_v44, %v1460_v45  ;;  %v1822_v52 = vld [vmem:[#allocation2 + $0x124] sm:$0xf]  ;;  %v1355_v59 = vor.u32 %v1798_v50, %v1352_v51 }
  0xcf   :  { %891 = vmatpush.bf16.msra.mxu3 %v1603_v3  ;;  %v1873_v47 = vld [vmem:[#allocation2 + $0x2bc] sm:$0xf]  ;;  %v1652_v48 = vld [vmem:[#allocation2 + $0x2c4] sm:$0xf0]  ;;  %v1559_v49 = vor.u32 %v1849_v24, %v1556_v46  ;;  %v1448_v54 = vld [vmem:[#allocation2 + $0x12c] sm:$0xf0] }
  0xd0   :  { %853 = vmatpush.bf16.msra.mxu0 %v1303_v10  ;;  %v1655_v53 = vor.u32 %v1873_v47, %v1652_v48  ;;  %v1846_v55 = vld [vmem:[#allocation2 + $0x1e4] sm:$0xf]  ;;  %v1544_v56 = vld [vmem:[#allocation2 + $0x1ec] sm:$0xf0]  ;;  %v1451_v60 = vor.u32 %v1822_v52, %v1448_v54  ;;  %v1795_v62 = vld [vmem:[#allocation2 + $0x4c] sm:$0xf] }
  0xd1   :  { %866 = vmatpush.bf16.msrb.mxu1 %v1399_v14  ;;  %v1870_v57 = vld [vmem:[#allocation2 + $0x2a4] sm:$0xf]  ;;  %v1640_v58 = vld [vmem:[#allocation2 + $0x2ac] sm:$0xf0]  ;;  %v1547_v61 = vor.u32 %v1846_v55, %v1544_v56  ;;  %v1340_v63 = vld [vmem:[#allocation2 + $0x54] sm:$0xf0] }
  0xd2   :  { %879 = vmatpush.bf16.msrb.mxu2 %v1495_v15  ;;  %v1819_v0 = vld [vmem:[#allocation2 + $0x10c] sm:$0xf]  ;;  %v1643_v1 = vor.u32 %v1870_v57, %v1640_v58  ;;  %v1436_v2 = vld [vmem:[#allocation2 + $0x114] sm:$0xf0]  ;;  %v1343_v7 = vor.u32 %v1795_v62, %v1340_v63  ;;  %v1792_v10 = vld [vmem:[#allocation2 + $0x34] sm:$0xf] }
  0xd3   :  { %892 = vmatpush.bf16.msra.mxu3 %v1591_v20  ;;  %854 = vmatmul.bf16.vlgmr.msra.gmra.mxu0 %v2159_v41  ;;  %v1843_v3 = vld [vmem:[#allocation2 + $0x1cc] sm:$0xf]  ;;  %v1532_v4 = vld [vmem:[#allocation2 + $0x1d4] sm:$0xf0]  ;;  %v1439_v8 = vor.u32 %v1819_v0, %v1436_v2  ;;  %v1328_v11 = vld [vmem:[#allocation2 + $0x3c] sm:$0xf0] }
  0xd4   :  { %898 = vmatpush.bf16.msrb.mxu0 %v1391_v21  ;;  %867 = vmatmul.bf16.vlgmr.msrb.gmra.mxu1 %v2164_v27  ;;  %v1867_v5 = vld [vmem:[#allocation2 + $0x28c] sm:$0xf]  ;;  %v1628_v6 = vld [vmem:[#allocation2 + $0x294] sm:$0xf0]  ;;  %v1535_v9 = vor.u32 %v1843_v3, %v1532_v4  ;;  %v1816_v12 = vld [vmem:[#allocation2 + $0xf4] sm:$0xf]  ;;  %v1331_v21 = vor.u32 %v1792_v10, %v1328_v11 }
  0xd5   :  { %911 = vmatpush.bf16.msra.mxu1 %v1487_v23  ;;  %880 = vmatmul.bf16.vlgmr.msrb.gmra.mxu2 %v2149_v37  ;;  %v1631_v13 = vor.u32 %v1867_v5, %v1628_v6  ;;  %v1424_v14 = vld [vmem:[#allocation2 + $0xfc] sm:$0xf0]  ;;  %v1840_v15 = vld [vmem:[#allocation2 + $0x1b4] sm:$0xf]  ;;  %v1789_v28 = vld [vmem:[#allocation2 + $0x1c] sm:$0xf] }
  0xd6   :  { %924 = vmatpush.bf16.msra.mxu2 %v1583_v26  ;;  %893 = vmatmul.bf16.vlgmr.msra.gmra.mxu3 %v2154_v40  ;;  %v1520_v16 = vld [vmem:[#allocation2 + $0x1bc] sm:$0xf0]  ;;  %v1864_v17 = vld [vmem:[#allocation2 + $0x274] sm:$0xf]  ;;  %v1427_v23 = vor.u32 %v1816_v12, %v1424_v14  ;;  %v1316_v29 = vld [vmem:[#allocation2 + $0x24] sm:$0xf0] }
  0xd7   :  { %937 = vmatpush.bf16.msrb.mxu3 %v1679_v31  ;;  %v1616_v20 = vld [vmem:[#allocation2 + $0x27c] sm:$0xf0]  ;;  %v1523_v26 = vor.u32 %v1840_v15, %v1520_v16  ;;  %v1813_v30 = vld [vmem:[#allocation2 + $0xdc] sm:$0xf]  ;;  %v1412_v34 = vld [vmem:[#allocation2 + $0xe4] sm:$0xf0] }
  0xd8   :  { %899 = vmatpush.bf16.msrb.mxu0 %v1379_v25  ;;  %v1619_v31 = vor.u32 %v1864_v17, %v1616_v20  ;;  %v1837_v35 = vld [vmem:[#allocation2 + $0x19c] sm:$0xf]  ;;  %v1508_v36 = vld [vmem:[#allocation2 + $0x1a4] sm:$0xf0]  ;;  %v1319_v25 = vor.u32 %v1789_v28, %v1316_v29  ;;  %v1415_v43 = vor.u32 %v1813_v30, %v1412_v34  ;;  %v1810_v44 = vld [vmem:[#allocation2 + $0xc4] sm:$0xf] }
  0xd9   :  { %912 = vmatpush.bf16.msra.mxu1 %v1475_v42  ;;  %v1861_v38 = vld [vmem:[#allocation2 + $0x25c] sm:$0xf]  ;;  %v1604_v39 = vld [vmem:[#allocation2 + $0x264] sm:$0xf0]  ;;  %v1786_v42 = vld [vmem:[#allocation2 + $0x4] sm:$0xf]  ;;  %v1511_v33 = vor.u32 %v1837_v35, %v1508_v36 }
  0xda   :  { %925 = vmatpush.bf16.msra.mxu2 %v1571_v32  ;;  %v1304_v32 = vld [vmem:[#allocation2 + $0xc] sm:$0xf0]  ;;  %v1834_v45 = vld [vmem:[#allocation2 + $0x184] sm:$0xf]  ;;  %v1607_v24 = vor.u32 %v1861_v38, %v1604_v39  ;;  %v1833_v51 = vld [vmem:[#allocation2 + $0x178] sm:$0xf0] }
  0xdb   :  { %938 = vmatpush.bf16.msrb.mxu3 %v1667_v22  ;;  %v1400_v22 = vld [vmem:[#allocation2 + $0xcc] sm:$0xf0]  ;;  %v1858_v47 = vld [vmem:[#allocation2 + $0x244] sm:$0xf]  ;;  %v1307_v50 = vor.u32 %v1786_v42, %v1304_v32  ;;  %v1881_v57 = vld [vmem:[#allocation2 + $0x2f8] sm:$0xf0] }
  0xdc   :  { %900 = vmatpush.bf16.msrb.mxu0 %v1367_v18  ;;  %v1496_v46 = vld [vmem:[#allocation2 + $0x18c] sm:$0xf0]  ;;  %v1403_v54 = vor.u32 %v1810_v44, %v1400_v22  ;;  %v1382_v62 = vld [vmem:[#allocation2 + $0x98] sm:$0xf]  ;;  %v1806_v63 = vld [vmem:[#allocation2 + $0xa0] sm:$0xf0] }
  0xdd   :  { %913 = vmatpush.bf16.msra.mxu1 %v1463_v19  ;;  %v1592_v48 = vld [vmem:[#allocation2 + $0x24c] sm:$0xf0]  ;;  %v1809_v19 = vld [vmem:[#allocation2 + $0xb8] sm:$0xf0]  ;;  %v1499_v55 = vor.u32 %v1834_v45, %v1496_v46  ;;  %v1478_v0 = vld [vmem:[#allocation2 + $0x158] sm:$0xf] }
  0xde   :  { %926 = vmatpush.bf16.msra.mxu2 %v1559_v49  ;;  %v1394_v18 = vld [vmem:[#allocation2 + $0xb0] sm:$0xf]  ;;  %v1595_v58 = vor.u32 %v1858_v47, %v1592_v48  ;;  %v1830_v2 = vld [vmem:[#allocation2 + $0x160] sm:$0xf0]  ;;  %v1574_v3 = vld [vmem:[#allocation2 + $0x218] sm:$0xf] }
  0xdf   :  { %939 = vmatpush.bf16.msrb.mxu3 %v1655_v53  ;;  %v1490_v49 = vld [vmem:[#allocation2 + $0x170] sm:$0xf]  ;;  %v1857_v53 = vld [vmem:[#allocation2 + $0x238] sm:$0xf0]  ;;  %v1854_v4 = vld [vmem:[#allocation2 + $0x220] sm:$0xf0] }
  0xe0   :  { %901 = vmatpush.bf16.msrb.mxu0 %v1355_v59  ;;  %v1586_v52 = vld [vmem:[#allocation2 + $0x230] sm:$0xf]  ;;  %v1395_v59 = vor.u32 %v1809_v19, %v1394_v18  ;;  %v1670_v5 = vld [vmem:[#allocation2 + $0x2d8] sm:$0xf]  ;;  %v1878_v6 = vld [vmem:[#allocation2 + $0x2e0] sm:$0xf0] }
  0xe1   :  { %914 = vmatpush.bf16.msra.mxu1 %v1451_v60  ;;  %v1682_v56 = vld [vmem:[#allocation2 + $0x2f0] sm:$0xf]  ;;  %v1491_v60 = vor.u32 %v1833_v51, %v1490_v49  ;;  %v1370_v10 = vld [vmem:[#allocation2 + $0x80] sm:$0xf]  ;;  %v1803_v11 = vld [vmem:[#allocation2 + $0x88] sm:$0xf0] }
  0xe2   :  { %927 = vmatpush.bf16.msra.mxu2 %v1547_v61  ;;  %v1587_v61 = vor.u32 %v1857_v53, %v1586_v52  ;;  %v1466_v12 = vld [vmem:[#allocation2 + $0x140] sm:$0xf]  ;;  %v1827_v14 = vld [vmem:[#allocation2 + $0x148] sm:$0xf0]  ;;  %v1358_v28 = vld [vmem:[#allocation2 + $0x68] sm:$0xf] }
  0xe3   :  { %940 = vmatpush.bf16.msrb.mxu3 %v1643_v1  ;;  %v1683_v1 = vor.u32 %v1881_v57, %v1682_v56  ;;  %v1562_v15 = vld [vmem:[#allocation2 + $0x200] sm:$0xf]  ;;  %v1851_v16 = vld [vmem:[#allocation2 + $0x208] sm:$0xf0]  ;;  %v1800_v29 = vld [vmem:[#allocation2 + $0x70] sm:$0xf0] }
  0xe4   :  { %902 = vmatpush.bf16.msrb.mxu0 %v1343_v7  ;;  %v1383_v7 = vor.u32 %v1806_v63, %v1382_v62  ;;  %v1658_v17 = vld [vmem:[#allocation2 + $0x2c0] sm:$0xf]  ;;  %v1875_v20 = vld [vmem:[#allocation2 + $0x2c8] sm:$0xf0]  ;;  %v1454_v30 = vld [vmem:[#allocation2 + $0x128] sm:$0xf] }
  0xe5   :  { %915 = vmatpush.bf16.msra.mxu1 %v1439_v8  ;;  %v1479_v8 = vor.u32 %v1830_v2, %v1478_v0  ;;  %v1824_v34 = vld [vmem:[#allocation2 + $0x130] sm:$0xf0]  ;;  %v1550_v35 = vld [vmem:[#allocation2 + $0x1e8] sm:$0xf]  ;;  %v1442_v44 = vld [vmem:[#allocation2 + $0x110] sm:$0xf] }
  0xe6   :  { %928 = vmatpush.bf16.msra.mxu2 %v1535_v9  ;;  %v1575_v9 = vor.u32 %v1854_v4, %v1574_v3  ;;  %v1848_v36 = vld [vmem:[#allocation2 + $0x1f0] sm:$0xf0]  ;;  %v1646_v38 = vld [vmem:[#allocation2 + $0x2a8] sm:$0xf]  ;;  %v1455_v42 = vor.u32 %v1824_v34, %v1454_v30  ;;  %v1821_v45 = vld [vmem:[#allocation2 + $0x118] sm:$0xf0] }
  0xe7   :  { %941 = vmatpush.bf16.msrb.mxu3 %v1631_v13  ;;  %v1671_v13 = vor.u32 %v1878_v6, %v1670_v5  ;;  %v1872_v39 = vld [vmem:[#allocation2 + $0x2b0] sm:$0xf0]  ;;  %v1551_v32 = vor.u32 %v1848_v36, %v1550_v35  ;;  %v1845_v46 = vld [vmem:[#allocation2 + $0x1d8] sm:$0xf0]  ;;  %v1634_v47 = vld [vmem:[#allocation2 + $0x290] sm:$0xf]  ;;  %v1443_v19 = vor.u32 %v1821_v45, %v1442_v44 }
  0xe8   :  { %903 = vmatpush.bf16.msrb.mxu0 %v1331_v21  ;;  %v1371_v21 = vor.u32 %v1803_v11, %v1370_v10  ;;  %v1647_v22 = vor.u32 %v1872_v39, %v1646_v38  ;;  %v1869_v48 = vld [vmem:[#allocation2 + $0x298] sm:$0xf0]  ;;  %v1794_v51 = vld [vmem:[#allocation2 + $0x40] sm:$0xf0]  ;;  %v1430_v52 = vld [vmem:[#allocation2 + $0xf8] sm:$0xf] }
  0xe9   :  { %916 = vmatpush.bf16.msra.mxu1 %v1427_v23  ;;  %v1467_v23 = vor.u32 %v1827_v14, %v1466_v12  ;;  %v1635_v53 = vor.u32 %v1869_v48, %v1634_v47  ;;  %v1842_v56 = vld [vmem:[#allocation2 + $0x1c0] sm:$0xf0]  ;;  %v1622_v57 = vld [vmem:[#allocation2 + $0x278] sm:$0xf]  ;;  %v1322_v62 = vld [vmem:[#allocation2 + $0x20] sm:$0xf] }
  0xea   :  { %929 = vmatpush.bf16.msra.mxu2 %v1523_v26  ;;  %v1563_v26 = vor.u32 %v1851_v16, %v1562_v15  ;;  %v1791_v63 = vld [vmem:[#allocation2 + $0x28] sm:$0xf0]  ;;  %v1418_v0 = vld [vmem:[#allocation2 + $0xe0] sm:$0xf]  ;;  %v1310_v10 = vld [vmem:[#allocation2 + $0x8] sm:$0xf] }
  0xeb   :  { %942 = vmatpush.bf16.msrb.mxu3 %v1619_v31  ;;  %v1659_v31 = vor.u32 %v1875_v20, %v1658_v17  ;;  %v1815_v2 = vld [vmem:[#allocation2 + $0xe8] sm:$0xf0]  ;;  %v1514_v3 = vld [vmem:[#allocation2 + $0x1a0] sm:$0xf]  ;;  %v1788_v11 = vld [vmem:[#allocation2 + $0x10] sm:$0xf0] }
  0xec   :  { %904 = vmatpush.bf16.msrb.mxu0 %v1319_v25  ;;  %v1359_v25 = vor.u32 %v1800_v29, %v1358_v28  ;;  %v1839_v4 = vld [vmem:[#allocation2 + $0x1a8] sm:$0xf0]  ;;  %v1610_v5 = vld [vmem:[#allocation2 + $0x260] sm:$0xf]  ;;  %v1406_v12 = vld [vmem:[#allocation2 + $0xc8] sm:$0xf] }
  0xed   :  { %917 = vmatpush.bf16.msra.mxu1 %v1415_v43  ;;  %v1346_v43 = vld [vmem:[#allocation2 + $0x50] sm:$0xf]  ;;  %v1863_v6 = vld [vmem:[#allocation2 + $0x268] sm:$0xf0]  ;;  %v1812_v14 = vld [vmem:[#allocation2 + $0xd0] sm:$0xf0] }
  0xee   :  { %930 = vmatpush.bf16.msra.mxu2 %v1511_v33  ;;  %v1797_v33 = vld [vmem:[#allocation2 + $0x58] sm:$0xf0]  ;;  %v1502_v15 = vld [vmem:[#allocation2 + $0x188] sm:$0xf]  ;;  %v1836_v16 = vld [vmem:[#allocation2 + $0x190] sm:$0xf0] }
  0xef   :  { %943 = vmatpush.bf16.msrb.mxu3 %v1607_v24  ;;  %v1538_v24 = vld [vmem:[#allocation2 + $0x1d0] sm:$0xf]  ;;  %v1347_v18 = vor.u32 %v1797_v33, %v1346_v43  ;;  %v1598_v17 = vld [vmem:[#allocation2 + $0x248] sm:$0xf]  ;;  %v1860_v20 = vld [vmem:[#allocation2 + $0x250] sm:$0xf0] }
  0xf0   :  { %905 = vmatpush.bf16.msrb.mxu0 %v1307_v50  ;;  %v1539_v49 = vor.u32 %v1845_v46, %v1538_v24  ;;  %v1334_v50 = vld [vmem:[#allocation2 + $0x38] sm:$0xf]  ;;  %v1599_v28 = vor.u32 %v1860_v20, %v1598_v17  ;;  %v326_v29 = vld [vmem:[%s2203_s4] sm:$0x7] }
  0xf1   :  { %918 = vmatpush.bf16.msra.mxu1 %v1403_v54  ;;  %v1818_v54 = vld [vmem:[#allocation2 + $0x100] sm:$0xf0]  ;;  %v328_v30 = vperm.slane %v326_v29, 0  ;;  %v329_v43 = vperm.slane %v326_v29, 1 }
  0xf2   :  { %931 = vmatpush.bf16.msra.mxu2 %v1499_v55  ;;  %v1526_v55 = vld [vmem:[#allocation2 + $0x1b8] sm:$0xf] }
  0xf3   :  { %944 = vmatpush.bf16.msrb.mxu3 %v1595_v58  ;;  %906 = vmatmul.bf16.vlgmr.msrb.gmra.mxu0 %v2159_v41  ;;  %v1866_v58 = vld [vmem:[#allocation2 + $0x280] sm:$0xf0] }
  0xf4   :  { %950 = vmatpush.bf16.msra.mxu0 %v1395_v59  ;;  %919 = vmatmul.bf16.vlgmr.msra.gmra.mxu1 %v2164_v27  ;;  %v1335_v59 = vor.u32 %v1794_v51, %v1334_v50 }
  0xf5   :  { %963 = vmatpush.bf16.msrb.mxu1 %v1491_v60  ;;  %932 = vmatmul.bf16.vlgmr.msra.gmra.mxu2 %v2149_v37  ;;  %v1431_v60 = vor.u32 %v1818_v54, %v1430_v52  ;;  %v330_v52 = vperm.slane %v326_v29, 2 }
  0xf6   :  { %976 = vmatpush.bf16.msrb.mxu2 %v1587_v61  ;;  %945 = vmatmul.bf16.vlgmr.msrb.gmra.mxu3 %v2154_v40  ;;  %v1527_v61 = vor.u32 %v1842_v56, %v1526_v55 }
  0xf7   :  { %989 = vmatpush.bf16.msra.mxu3 %v1683_v1  ;;  %v1623_v1 = vor.u32 %v1866_v58, %v1622_v57 }
  0xf8   :  { %951 = vmatpush.bf16.msra.mxu0 %v1383_v7  ;;  %v1323_v7 = vor.u32 %v1791_v63, %v1322_v62 }
  0xf9   :  { %964 = vmatpush.bf16.msrb.mxu1 %v1479_v8  ;;  %v1419_v8 = vor.u32 %v1815_v2, %v1418_v0 }
  0xfa   :  { %977 = vmatpush.bf16.msrb.mxu2 %v1575_v9  ;;  %v1515_v9 = vor.u32 %v1839_v4, %v1514_v3 }
  0xfb   :  { %990 = vmatpush.bf16.msra.mxu3 %v1671_v13  ;;  %v1611_v13 = vor.u32 %v1863_v6, %v1610_v5 }
  0xfc   :  { %952 = vmatpush.bf16.msra.mxu0 %v1371_v21  ;;  %v1311_v21 = vor.u32 %v1788_v11, %v1310_v10 }
  0xfd   :  { %965 = vmatpush.bf16.msrb.mxu1 %v1467_v23  ;;  %v1407_v23 = vor.u32 %v1812_v14, %v1406_v12 }
  0xfe   :  { %978 = vmatpush.bf16.msrb.mxu2 %v1563_v26  ;;  %v1503_v26 = vor.u32 %v1836_v16, %v1502_v15 }
  0xff   :  { %991 = vmatpush.bf16.msra.mxu3 %v1659_v31 }
 0x100   :  { %953 = vmatpush.bf16.msra.mxu0 %v1359_v25 }
 0x101   :  { %966 = vmatpush.bf16.msrb.mxu1 %v1455_v42 }
 0x102   :  { %979 = vmatpush.bf16.msrb.mxu2 %v1551_v32 }
 0x103   :  { %992 = vmatpush.bf16.msra.mxu3 %v1647_v22 }
 0x104   :  { %954 = vmatpush.bf16.msra.mxu0 %v1347_v18 }
 0x105   :  { %967 = vmatpush.bf16.msrb.mxu1 %v1443_v19 }
 0x106   :  { %980 = vmatpush.bf16.msrb.mxu2 %v1539_v49 }
 0x107   :  { %993 = vmatpush.bf16.msra.mxu3 %v1635_v53 }
 0x108   :  { %955 = vmatpush.bf16.msra.mxu0 %v1335_v59 }
 0x109   :  { %968 = vmatpush.bf16.msrb.mxu1 %v1431_v60 }
 0x10a   :  { %981 = vmatpush.bf16.msrb.mxu2 %v1527_v61 }
 0x10b   :  { %994 = vmatpush.bf16.msra.mxu3 %v1623_v1 }
 0x10c   :  { %956 = vmatpush.bf16.msra.mxu0 %v1323_v7 }
 0x10d   :  { %969 = vmatpush.bf16.msrb.mxu1 %v1419_v8 }
 0x10e   :  { %982 = vmatpush.bf16.msrb.mxu2 %v1515_v9 }
 0x10f   :  { %995 = vmatpush.bf16.msra.mxu3 %v1611_v13 }
 0x110   :  { %957 = vmatpush.bf16.msra.mxu0 %v1311_v21 }
 0x111   :  { %970 = vmatpush.bf16.msrb.mxu1 %v1407_v23 }
 0x112   :  { %983 = vmatpush.bf16.msrb.mxu2 %v1503_v26 }
 0x113   :  { %996 = vmatpush.bf16.msra.mxu3 %v1599_v28  ;;  %958 = vmatmul.bf16.vlgmr.msra.gmra.mxu0 %v2159_v41 }
 0x114   :  { %971 = vmatmul.bf16.vlgmr.msrb.gmra.mxu1 %v2164_v27 }
 0x115   :  { %984 = vmatmul.bf16.vlgmr.msrb.gmra.mxu2 %v2149_v37 }
 0x116   :  { %997 = vmatmul.bf16.vlgmr.msra.gmra.mxu3 %v2154_v40 }
 0x150   :  { %v855_v31 = vpop.f32.mrf.mxu0 }
 0x151   :  { %v856_v34 = vadd.f32 %v855_v31, %v328_v30  ;;  %v868_v35 = vpop.f32.mrf.mxu1 }
 0x153   :  { %v869_v36 = vadd.f32 %v868_v35, %v856_v34 }
 0x158   :  { %v881_v38 = vpop.f32.mrf.mxu2  ;;  %v857_v41 = vpop.f32.mrf.mxu0 }
 0x159   :  { %v882_v39 = vadd.f32 %v881_v38, %v869_v36  ;;  %v894_v25 = vpop.f32.mrf.mxu3  ;;  %v870_v27 = vpop.f32.mrf.mxu1 }
 0x15b   :  { %v2181_v42 = vadd.f32 %v894_v25, %v882_v39 }
 0x15d   :  { %v1002_v37 = vmax.f32 %v2181_v42, 0.0 }
 0x160   :  { %v883_v32 = vpop.f32.mrf.mxu2 }
 0x161   :  { %v896_v40 = vpop.f32.mrf.mxu3 }
 0x170   :  { %v907_v33 = vpop.f32.mrf.mxu0 }
 0x171   :  { %v908_v44 = vadd.f32 %v907_v33, %v329_v43  ;;  %v920_v22 = vpop.f32.mrf.mxu1 }
 0x173   :  { %v921_v45 = vadd.f32 %v920_v22, %v908_v44 }
 0x178   :  { %v933_v24 = vpop.f32.mrf.mxu2  ;;  %v909_v18 = vpop.f32.mrf.mxu0 }
 0x179   :  { %v934_v46 = vadd.f32 %v933_v24, %v921_v45  ;;  %v946_v47 = vpop.f32.mrf.mxu3  ;;  %v922_v19 = vpop.f32.mrf.mxu1 }
 0x17b   :  { %v2184_v48 = vadd.f32 %v946_v47, %v934_v46 }
 0x17d   :  { %v1003_v49 = vmax.f32 %v2184_v48, 0.0 }
 0x180   :  { %v935_v50 = vpop.f32.mrf.mxu2 }
 0x181   :  { %v948_v51 = vpop.f32.mrf.mxu3 }
 0x190   :  { %v959_v53 = vpop.f32.mrf.mxu0 }
 0x191   :  { %v960_v54 = vadd.f32 %v959_v53, %v330_v52  ;;  %v972_v55 = vpop.f32.mrf.mxu1 }
 0x193   :  { %v973_v56 = vadd.f32 %v972_v55, %v960_v54 }
 0x198   :  { %v985_v57 = vpop.f32.mrf.mxu2  ;;  %v961_v60 = vpop.f32.mrf.mxu0 }
 0x199   :  { %v986_v58 = vadd.f32 %v985_v57, %v973_v56  ;;  %v998_v59 = vpop.f32.mrf.mxu3  ;;  %v974_v61 = vpop.f32.mrf.mxu1 }
 0x19b   :  { %v999_v62 = vadd.f32 %v998_v59, %v986_v58 }
 0x19d   :  { %v1004_v63 = vmax.f32 %v999_v62, 0.0 }
 0x1a0   :  { %v987_v0 = vpop.f32.mrf.mxu2 }
 0x1a1   :  { %v1000_v1 = vpop.f32.mrf.mxu3 }
 0x1a2   :  { %2067 = dma.done.wait [#allocation4 + $0x1], 3072 }
 0x1a3   :  { %2068 = vsyncadd [#allocation4 + $0x1], 4294964224  ;;  %v1889_v2 = vld [vmem:[#allocation3 + $0x38] sm:$0xff]  ;;  %v1888_v5 = vld [vmem:[#allocation3 + $0x30] sm:$0xff]  ;;  %v1009_v34 = vpack.c.bf16 %v1002_v37, %v1002_v37  ;;  %v1010_v35 = vpack.c.bf16 %v1003_v49, %v1003_v49  ;;  %v1011_v36 = vpack.c.bf16 %v1004_v63, %v1004_v63  ;;  %s2078_s26 = smov [#allocation11]   ;;  %s1256_s30 = sshll.u32 %s2206_s7, 4  ;;  %s1257_s30 = int_to_ptr.hbm [resolvable:$true] %s1256_s30 }
 0x1a4   :  { %v1897_v3 = vld [vmem:[#allocation3 + $0x78] sm:$0xff]  ;;  %1208 = vmatpush.bf16.msrb.mxu0 %v1889_v2  ;;  %v1896_v6 = vld [vmem:[#allocation3 + $0x70] sm:$0xff]  ;;  %v1887_v8 = vld [vmem:[#allocation3 + $0x28] sm:$0xff]  ;;  %s1254_s27 = sshll.u32 %s2078_s26, 4  ;;  %s1255_s27 = int_to_ptr.vmem [resolvable:$true] %s1254_s27 }
 0x1a5   :  { %v1905_v4 = vld [vmem:[#allocation3 + $0xb8] sm:$0xff]  ;;  %1221 = vmatpush.bf16.msra.mxu1 %v1897_v3  ;;  %v1904_v7 = vld [vmem:[#allocation3 + $0xb0] sm:$0xff]  ;;  %v1895_v9 = vld [vmem:[#allocation3 + $0x68] sm:$0xff] }
 0x1a6   :  { %1234 = vmatpush.bf16.msra.mxu2 %v1905_v4  ;;  %v1903_v10 = vld [vmem:[#allocation3 + $0xa8] sm:$0xff]  ;;  %v1886_v11 = vld [vmem:[#allocation3 + $0x20] sm:$0xff]  ;;  %v1885_v14 = vld [vmem:[#allocation3 + $0x18] sm:$0xff] }
 0x1a7   :  { %v1894_v12 = vld [vmem:[#allocation3 + $0x60] sm:$0xff]  ;;  %v1893_v15 = vld [vmem:[#allocation3 + $0x58] sm:$0xff]  ;;  %v1884_v17 = vld [vmem:[#allocation3 + $0x10] sm:$0xff] }
 0x1a8   :  { %1209 = vmatpush.bf16.msrb.mxu0 %v1888_v5  ;;  %v1902_v13 = vld [vmem:[#allocation3 + $0xa0] sm:$0xff]  ;;  %v1901_v16 = vld [vmem:[#allocation3 + $0x98] sm:$0xff]  ;;  %v1892_v20 = vld [vmem:[#allocation3 + $0x50] sm:$0xff] }
 0x1a9   :  { %1222 = vmatpush.bf16.msra.mxu1 %v1896_v6  ;;  %v1900_v21 = vld [vmem:[#allocation3 + $0x90] sm:$0xff]  ;;  %v1883_v23 = vld [vmem:[#allocation3 + $0x8] sm:$0xff]  ;;  %v1882_v29 = vld [vmem:[#allocation3] sm:$0xff] }
 0x1aa   :  { %1235 = vmatpush.bf16.msra.mxu2 %v1904_v7  ;;  %v1891_v26 = vld [vmem:[#allocation3 + $0x48] sm:$0xff]  ;;  %v1890_v30 = vld [vmem:[#allocation3 + $0x40] sm:$0xff] }
 0x1ab   :  { %v1899_v28 = vld [vmem:[#allocation3 + $0x88] sm:$0xff]  ;;  %v1898_v31 = vld [vmem:[#allocation3 + $0x80] sm:$0xff] }
 0x1ac   :  { %1210 = vmatpush.bf16.msrb.mxu0 %v1887_v8  ;;  %v1914_v38 = vld [vmem:[%s2205_s6] ss:$0 sm:$0xff] }
 0x1ad   :  { %1223 = vmatpush.bf16.msra.mxu1 %v1895_v9 }
 0x1ae   :  { %1236 = vmatpush.bf16.msra.mxu2 %v1903_v10 }
 0x1b0   :  { %1211 = vmatpush.bf16.msrb.mxu0 %v1886_v11 }
 0x1b1   :  { %1224 = vmatpush.bf16.msra.mxu1 %v1894_v12 }
 0x1b2   :  { %1237 = vmatpush.bf16.msra.mxu2 %v1902_v13 }
 0x1b4   :  { %1212 = vmatpush.bf16.msrb.mxu0 %v1885_v14 }
 0x1b5   :  { %1225 = vmatpush.bf16.msra.mxu1 %v1893_v15 }
 0x1b6   :  { %1238 = vmatpush.bf16.msra.mxu2 %v1901_v16 }
 0x1b8   :  { %1213 = vmatpush.bf16.msrb.mxu0 %v1884_v17 }
 0x1b9   :  { %1226 = vmatpush.bf16.msra.mxu1 %v1892_v20 }
 0x1ba   :  { %1239 = vmatpush.bf16.msra.mxu2 %v1900_v21 }
 0x1bc   :  { %1214 = vmatpush.bf16.msrb.mxu0 %v1883_v23 }
 0x1bd   :  { %1227 = vmatpush.bf16.msra.mxu1 %v1891_v26 }
 0x1be   :  { %1240 = vmatpush.bf16.msra.mxu2 %v1899_v28 }
 0x1c0   :  { %1215 = vmatpush.bf16.msrb.mxu0 %v1882_v29 }
 0x1c1   :  { %1228 = vmatpush.bf16.msra.mxu1 %v1890_v30 }
 0x1c2   :  { %1241 = vmatpush.bf16.msra.mxu2 %v1898_v31 }
 0x1c3   :  { %1216 = vmatmul.bf16.vlgmr.msrb.gmra.mxu0 %v1009_v34 }
 0x1c4   :  { %1229 = vmatmul.bf16.vlgmr.msra.gmra.mxu1 %v1010_v35 }
 0x1c5   :  { %1242 = vmatmul.bf16.vlgmr.msra.gmra.mxu2 %v1011_v36 }
 0x240   :  { %v1217_v39 = vpop.f32.mrf.mxu0 }
 0x241   :  { %v1230_v25 = vpop.f32.mrf.mxu1  ;;  %v1218_v42 = vadd.f32 %v1914_v38, %v1217_v39 }
 0x243   :  { %v1231_v41 = vadd.f32 %v1230_v25, %v1218_v42 }
 0x248   :  { %v1243_v27 = vpop.f32.mrf.mxu2  ;;  %v1219_v32 = vpop.f32.mrf.mxu0 }
 0x249   :  { %v1244_v37 = vadd.f32 %v1243_v27, %v1231_v41  ;;  %v1232_v40 = vpop.f32.mrf.mxu1 }
 0x24b   :  { %1915 = vtanh.f32 %v1244_v37 }
 0x250   :  { %v1245_v43 = vpop.f32.mrf.mxu2 }
 0x251   :  { %v1916_v33 = vpop.eup %1915 }
 0x252   :  { %1248 = vst [vmem:[#allocation11] sm:$0xff] %v1916_v33 }
 0x253   :  { %1259 = dma.vmem_to_hbm [thread:$0]  %s1255_s27, 128, %s1257_s30, [#allocation7]  }
 0x254   :  { %2069 = dma.done.wait [#allocation7], 128  }
 0x255   :  { %2070 = vsyncadd [#allocation7], 4294967168 }
 0x256   :  { %1264 = vsyncpa [#allocation6], 1 }
 0x257   :  { %1265 = vsyncpa [#allocation9], 1 }
 0x258   :  { %1266 = vsyncpa [#allocation7], 1 }
 0x259   :  { %1267 = vsyncmov [#allocation4] }
 0x25c   :  { %s1268_s6 = vpop.sfrf %1267 }
 0x25d   :  { %p1780_p0 = scmp.ne.s32.totalorder %s1268_s6, 0 }
 0x25f   :  { %1272 = shalt.err (%p1780_p0)  }
 0x260   :  { %1274 = vsyncmov [#allocation4 + $0x1] }
 0x263   :  { %s1275_s8 = vpop.sfrf %1274 }
 0x264   :  { %p1781_p1 = scmp.ne.s32.totalorder %s1275_s8, 0 }
 0x266   :  { %1279 = shalt.err (%p1781_p1)  }

</bundles_post_ra>
